<compile_context>
chip_gen: v7x
topology: tpu7x:2x2x1
jax: 0.10.0
libtpu: 0.0.40
codegen_flags: <defaults>
</compile_context>

<pallas_src>
import jax
import jax.numpy as jnp
from jax.experimental import pallas as pl
from jax.experimental.pallas import tpu as pltpu


# ------------------------------ kernel ------------------------------------- #

def _np_encoder_kernel(x_ref, y_ref, w1x_ref, w1y_ref, b1_ref,
                       w2_ref, b2_ref, w3_ref, b3_ref, out_ref):
    dot_dtype = w1x_ref.dtype            # bf16 (default) or f32 operands

    # Layer 1: fused concat as a split matmul, f32 accumulation.
    h = jnp.dot(x_ref[...].astype(dot_dtype), w1x_ref[...],
                preferred_element_type=jnp.float32)
    h = h + jnp.dot(y_ref[...].astype(dot_dtype), w1y_ref[...],
                    preferred_element_type=jnp.float32)
    h = jnp.maximum(h + b1_ref[...], 0.0)            # f32 bias + ReLU

    # Layer 2.
    h = jnp.dot(h.astype(dot_dtype), w2_ref[...],
                preferred_element_type=jnp.float32)
    h = jnp.maximum(h + b2_ref[...], 0.0)

    # Layer 3.
    r = jnp.dot(h.astype(dot_dtype), w3_ref[...],
                preferred_element_type=jnp.float32)
    out_ref[...] = (r + b3_ref[...]).astype(out_ref.dtype)


# ------------------------------ helpers ------------------------------------ #

def _round_up(n, m):
    return ((n + m - 1) // m) * m


def _pad_hidden(d):
    # No padding bytes for small hidden dims (full-dim blocks are legal);
    # pad to the 256-wide v6e/v7x MXU granularity when the hidden dim is large.
    return d if d <= 128 else _round_up(d, 256)


def _pad2(a, rows, cols):
    return jnp.pad(a, ((0, rows - a.shape[0]), (0, cols - a.shape[1])))


def prepare_encoder_params(params, x_dim, *, dot_dtype=jnp.bfloat16):
    """One-time weight prep: split W1 for the fused concat, pad hidden dim,
    cast matmul operands to dot_dtype.  Biases stay f32."""
    w1, w2, w3 = params["w1"], params["w2"], params["w3"]
    H = w2.shape[0]
    R = w3.shape[1]
    H_p = _pad_hidden(H)
    y_dim = w1.shape[0] - x_dim
    return {
        "w1x": _pad2(w1[:x_dim], x_dim, H_p).astype(dot_dtype),
        "w1y": _pad2(w1[x_dim:], y_dim, H_p).astype(dot_dtype),
        "b1": _pad2(params["b1"].reshape(1, H), 1, H_p).astype(jnp.float32),
        "w2": _pad2(w2, H_p, H_p).astype(dot_dtype),
        "b2": _pad2(params["b2"].reshape(1, H), 1, H_p).astype(jnp.float32),
        "w3": _pad2(w3, H_p, R).astype(dot_dtype),
        "b3": params["b3"].reshape(1, R).astype(jnp.float32),
    }


# ------------------------------ wrapper ------------------------------------ #

def np_encoder_forward(x, y, enc, *, tm=1024, out_dtype=jnp.float32):
    """Pallas NPEncoder.forward.

    x: (B, N, Dx), y: (B, N, Dy)  ->  (B, N, r_dim) in out_dtype.
    `enc` comes from prepare_encoder_params().
    """
    B, N, Dx = x.shape
    Dy = y.shape[-1]
    R = enc["w3"].shape[1]
    M = B * N
    if M == 0:
        return jnp.zeros((B, N, R), dtype=out_dtype)

    x2 = x.reshape(M, Dx)
    y2 = y.reshape(M, Dy)

    # Row tile: multiple of 16 sublanes (safe for bf16 and f32 blocks); keep
    # at least 2 grid steps when there is enough work so v7x's two TensorCores
    # both get a share of the ("parallel",) grid axis.
    SUB = 16
    tm = max(SUB, (tm // SUB) * SUB)
    cap = _round_up(pl.cdiv(M, 2), SUB) if M > SUB else _round_up(M, SUB)
    TM = min(tm, cap)
    grid = (pl.cdiv(M, TM),)            # non-divisible last block is masked

    const = lambda a: pl.BlockSpec(a.shape, lambda i: (0, 0))  # resident operand

    out2 = pl.pallas_call(
        _np_encoder_kernel,
        out_shape=jax.ShapeDtypeStruct((M, R), out_dtype),
        grid_spec=pltpu.PrefetchScalarGridSpec(
            num_scalar_prefetch=0,
            grid=grid,
            in_specs=[
                pl.BlockSpec((TM, Dx), lambda i: (i, 0)),   # true-dim lanes
                pl.BlockSpec((TM, Dy), lambda i: (i, 0)),
                const(enc["w1x"]), const(enc["w1y"]), const(enc["b1"]),
                const(enc["w2"]), const(enc["b2"]),
                const(enc["w3"]), const(enc["b3"]),
            ],
            out_specs=pl.BlockSpec((TM, R), lambda i: (i, 0)),  # true r_dim
        ),
        compiler_params=pltpu.CompilerParams(
            dimension_semantics=("parallel",),
            vmem_limit_bytes=32 * 1024 * 1024,
        ),
    )(x2, y2, enc["w1x"], enc["w1y"], enc["b1"],
      enc["w2"], enc["b2"], enc["w3"], enc["b3"])

    return out2.reshape(B, N, R)


# -------------------------- parameters / reference ------------------------- #

def init_params(key, x_dim, y_dim, hidden_dim, r_dim):
    ks = jax.random.split(key, 6)
    s = 0.05

    def rn(k, shape):
        return jax.random.normal(k, shape, dtype=jnp.float32) * s

    return {
        "w1": rn(ks[0], (x_dim + y_dim, hidden_dim)),
        "b1": rn(ks[1], (hidden_dim,)),
        "w2": rn(ks[2], (hidden_dim, hidden_dim)),
        "b2": rn(ks[3], (hidden_dim,)),
        "w3": rn(ks[4], (hidden_dim, r_dim)),
        "b3": rn(ks[5], (r_dim,)),
    }


def np_encoder_reference(x, y, params):
    """Plain-JAX reference mirroring the PyTorch NPEncoder semantics."""
    dot = lambda a, b: jnp.dot(a, b, precision=jax.lax.Precision.HIGHEST)
    xy = jnp.concatenate([x, y], axis=-1)
    h = jnp.maximum(dot(xy, params["w1"]) + params["b1"], 0.0)
    h = jnp.maximum(dot(h, params["w2"]) + params["b2"], 0.0)
    return dot(h, params["w3"]) + params["b3"]


def _check(out, ref, atol, rtol, name):
    err = float(jnp.max(jnp.abs(out - ref)))
    assert jnp.allclose(out, ref, atol=atol, rtol=rtol), f"{name}: max err {err}"


# -------------------------------- main -------------------------------------- #

if __name__ == "__main__":
    B, N, X_DIM, Y_DIM, HIDDEN, R_DIM = 2, 64, 16, 8, 32, 32

    key = jax.random.PRNGKey(0)
    k_p, k_x, k_y = jax.random.split(key, 3)

    params = init_params(k_p, X_DIM, Y_DIM, HIDDEN, R_DIM)
    x = jax.random.normal(k_x, (B, N, X_DIM), dtype=jnp.float32)
    labels = jax.random.randint(k_y, (B, N), 0, Y_DIM)
    y = jax.nn.one_hot(labels, Y_DIM, dtype=jnp.float32)
    ref = np_encoder_reference(x, y, params)

    fwd = jax.jit(np_encoder_forward)

    # Default path: bf16 MXU operands, f32 accumulation.
    enc_bf16 = prepare_encoder_params(params, X_DIM)
    out = jax.block_until_ready(fwd(x, y, enc_bf16))
    assert out.shape == (B, N, R_DIM), out.shape
    _check(out, ref, 2e-2, 2e-2, "bf16")

    # f32 operand path (tighter tolerance).
    enc_f32 = prepare_encoder_params(params, X_DIM, dot_dtype=jnp.float32)
    out32 = jax.block_until_ready(fwd(x, y, enc_f32))
    _check(out32, ref, 2e-3, 1e-2, "f32")

    # Ragged row count (B*N = 15): exercises the masked last/only row block.
    x2 = jax.random.normal(jax.random.fold_in(key, 1), (3, 5, X_DIM), dtype=jnp.float32)
    y2 = jax.nn.one_hot(jax.random.randint(jax.random.fold_in(key, 2), (3, 5), 0, Y_DIM),
                        Y_DIM, dtype=jnp.float32)
    out2 = jax.block_until_ready(fwd(x2, y2, enc_f32))
    ref2 = np_encoder_reference(x2, y2, params)
    assert out2.shape == (3, 5, R_DIM), out2.shape
    _check(out2, ref2, 2e-3, 1e-2, "ragged")

    # Hidden-dim padding path (H=160 -> padded to 256) + non-divisible grid
    # (M=80, TM=48 -> 2 steps, masked last tile) + odd feature dims.
    params3 = init_params(jax.random.fold_in(key, 3), 5, 3, 160, 48)
    enc3 = prepare_encoder_params(params3, 5, dot_dtype=jnp.float32)
    x3 = jax.random.normal(jax.random.fold_in(key, 4), (2, 40, 5), dtype=jnp.float32)
    y3 = jax.random.normal(jax.random.fold_in(key, 5), (2, 40, 3), dtype=jnp.float32)
    out3 = jax.block_until_ready(fwd(x3, y3, enc3))
    ref3 = np_encoder_reference(x3, y3, params3)
    assert out3.shape == (2, 40, 48), out3.shape
    _check(out3, ref3, 2e-3, 1e-2, "padded-hidden")

    print("KERNEL_OK")
</pallas_src>

<mosaic_0001>
module attributes {stable_mosaic.version = 11 : i64} {
  func.func @_np_encoder_kernel(%arg0: i32, %arg1: memref<64x16xf32, #tpu.memory_space<vmem>>, %arg2: memref<64x8xf32, #tpu.memory_space<vmem>>, %arg3: memref<16x32xbf16, #tpu.memory_space<vmem>>, %arg4: memref<8x32xbf16, #tpu.memory_space<vmem>>, %arg5: memref<1x32xf32, #tpu.memory_space<vmem>>, %arg6: memref<32x32xbf16, #tpu.memory_space<vmem>>, %arg7: memref<1x32xf32, #tpu.memory_space<vmem>>, %arg8: memref<32x32xbf16, #tpu.memory_space<vmem>>, %arg9: memref<1x32xf32, #tpu.memory_space<vmem>>, %arg10: memref<64x32xf32, #tpu.memory_space<vmem>>) attributes {dimension_semantics = [#tpu.dimension_semantics<parallel>], iteration_bounds = array<i64: 2>, scalar_prefetch = 0 : i64, scratch_operands = 0 : i64, tpu.core_type = #tpu.core_type<tc>, window_params = [{transform_indices = @transform_0, window_bounds = array<i64: 64, 16>}, {transform_indices = @transform_1, window_bounds = array<i64: 64, 8>}, {pipeline_mode = #tpu.pipeline_mode<synchronous>, transform_indices = @transform_2, window_bounds = array<i64: 16, 32>}, {pipeline_mode = #tpu.pipeline_mode<synchronous>, transform_indices = @transform_3, window_bounds = array<i64: 8, 32>}, {pipeline_mode = #tpu.pipeline_mode<synchronous>, transform_indices = @transform_4, window_bounds = array<i64: 1, 32>}, {pipeline_mode = #tpu.pipeline_mode<synchronous>, transform_indices = @transform_5, window_bounds = array<i64: 32, 32>}, {pipeline_mode = #tpu.pipeline_mode<synchronous>, transform_indices = @transform_6, window_bounds = array<i64: 1, 32>}, {pipeline_mode = #tpu.pipeline_mode<synchronous>, transform_indices = @transform_7, window_bounds = array<i64: 32, 32>}, {pipeline_mode = #tpu.pipeline_mode<synchronous>, transform_indices = @transform_8, window_bounds = array<i64: 1, 32>}, {transform_indices = @transform_9, window_bounds = array<i64: 64, 32>}]} {
    %c0 = arith.constant 0 : index
    %c0_0 = arith.constant 0 : index
    %0 = vector.load %arg1[%c0, %c0_0] : memref<64x16xf32, #tpu.memory_space<vmem>>, vector<64x16xf32>
    %1 = arith.truncf %0 : vector<64x16xf32> to vector<64x16xbf16>
    %c0_1 = arith.constant 0 : index
    %c0_2 = arith.constant 0 : index
    %2 = vector.load %arg3[%c0_1, %c0_2] : memref<16x32xbf16, #tpu.memory_space<vmem>>, vector<16x32xbf16>
    %cst = arith.constant dense<0.000000e+00> : vector<64x32xf32>
    %3 = tpu.matmul %1, %2, %cst {dimension_numbers = #tpu.dot_dimension_numbers<[1], [0], [0], [1], [0, 0, 1, 1], [], []>} : vector<64x16xbf16>, vector<16x32xbf16>, vector<64x32xf32> -> vector<64x32xf32>
    %c0_3 = arith.constant 0 : index
    %c0_4 = arith.constant 0 : index
    %4 = vector.load %arg2[%c0_3, %c0_4] : memref<64x8xf32, #tpu.memory_space<vmem>>, vector<64x8xf32>
    %5 = arith.truncf %4 : vector<64x8xf32> to vector<64x8xbf16>
    %c0_5 = arith.constant 0 : index
    %c0_6 = arith.constant 0 : index
    %6 = vector.load %arg4[%c0_5, %c0_6] : memref<8x32xbf16, #tpu.memory_space<vmem>>, vector<8x32xbf16>
    %cst_7 = arith.constant dense<0.000000e+00> : vector<64x32xf32>
    %7 = tpu.matmul %5, %6, %cst_7 {dimension_numbers = #tpu.dot_dimension_numbers<[1], [0], [0], [1], [0, 0, 1, 1], [], []>} : vector<64x8xbf16>, vector<8x32xbf16>, vector<64x32xf32> -> vector<64x32xf32>
    %8 = arith.addf %3, %7 : vector<64x32xf32>
    %c0_8 = arith.constant 0 : index
    %c0_9 = arith.constant 0 : index
    %9 = vector.load %arg5[%c0_8, %c0_9] : memref<1x32xf32, #tpu.memory_space<vmem>>, vector<1x32xf32>
    %10 = vector.broadcast %9 : vector<1x32xf32> to vector<64x32xf32>
    %11 = arith.addf %8, %10 : vector<64x32xf32>
    %cst_10 = arith.constant 0.000000e+00 : f32
    %12 = vector.broadcast %cst_10 : f32 to vector<64x32xf32>
    %13 = arith.maximumf %11, %12 : vector<64x32xf32>
    %14 = arith.truncf %13 : vector<64x32xf32> to vector<64x32xbf16>
    %c0_11 = arith.constant 0 : index
    %c0_12 = arith.constant 0 : index
    %15 = vector.load %arg6[%c0_11, %c0_12] : memref<32x32xbf16, #tpu.memory_space<vmem>>, vector<32x32xbf16>
    %cst_13 = arith.constant dense<0.000000e+00> : vector<64x32xf32>
    %16 = tpu.matmul %14, %15, %cst_13 {dimension_numbers = #tpu.dot_dimension_numbers<[1], [0], [0], [1], [0, 0, 1, 1], [], []>} : vector<64x32xbf16>, vector<32x32xbf16>, vector<64x32xf32> -> vector<64x32xf32>
    %c0_14 = arith.constant 0 : index
    %c0_15 = arith.constant 0 : index
    %17 = vector.load %arg7[%c0_14, %c0_15] : memref<1x32xf32, #tpu.memory_space<vmem>>, vector<1x32xf32>
    %18 = vector.broadcast %17 : vector<1x32xf32> to vector<64x32xf32>
    %19 = arith.addf %16, %18 : vector<64x32xf32>
    %cst_16 = arith.constant 0.000000e+00 : f32
    %20 = vector.broadcast %cst_16 : f32 to vector<64x32xf32>
    %21 = arith.maximumf %19, %20 : vector<64x32xf32>
    %22 = arith.truncf %21 : vector<64x32xf32> to vector<64x32xbf16>
    %c0_17 = arith.constant 0 : index
    %c0_18 = arith.constant 0 : index
    %23 = vector.load %arg8[%c0_17, %c0_18] : memref<32x32xbf16, #tpu.memory_space<vmem>>, vector<32x32xbf16>
    %cst_19 = arith.constant dense<0.000000e+00> : vector<64x32xf32>
    %24 = tpu.matmul %22, %23, %cst_19 {dimension_numbers = #tpu.dot_dimension_numbers<[1], [0], [0], [1], [0, 0, 1, 1], [], []>} : vector<64x32xbf16>, vector<32x32xbf16>, vector<64x32xf32> -> vector<64x32xf32>
    %c0_20 = arith.constant 0 : index
    %c0_21 = arith.constant 0 : index
    %25 = vector.load %arg9[%c0_20, %c0_21] : memref<1x32xf32, #tpu.memory_space<vmem>>, vector<1x32xf32>
    %26 = vector.broadcast %25 : vector<1x32xf32> to vector<64x32xf32>
    %27 = arith.addf %24, %26 : vector<64x32xf32>
    %c0_22 = arith.constant 0 : index
    %c0_23 = arith.constant 0 : index
    %28 = vector.load %arg10[%c0_22, %c0_23] : memref<64x32xf32, #tpu.memory_space<vmem>>, vector<64x32xf32>
    tpu.vector_store %arg10[%c0_22, %c0_23], %27 {strides = array<i32>} : memref<64x32xf32, #tpu.memory_space<vmem>>, vector<64x32xf32>,
    return
  }
  func.func @transform_0(%arg0: i32) -> (i32, i32) {
    %c0_i32 = arith.constant 0 : i32
    %c0_i32_0 = arith.constant 0 : i32
    return %arg0, %c0_i32 : i32, i32
  }
  func.func @transform_1(%arg0: i32) -> (i32, i32) {
    %c0_i32 = arith.constant 0 : i32
    %c0_i32_0 = arith.constant 0 : i32
    return %arg0, %c0_i32 : i32, i32
  }
  func.func @transform_2(%arg0: i32) -> (i32, i32) {
    %c0_i32 = arith.constant 0 : i32
    %c0_i32_0 = arith.constant 0 : i32
    %c0_i32_1 = arith.constant 0 : i32
    return %c0_i32, %c0_i32_0 : i32, i32
  }
  func.func @transform_3(%arg0: i32) -> (i32, i32) {
    %c0_i32 = arith.constant 0 : i32
    %c0_i32_0 = arith.constant 0 : i32
    %c0_i32_1 = arith.constant 0 : i32
    return %c0_i32, %c0_i32_0 : i32, i32
  }
  func.func @transform_4(%arg0: i32) -> (i32, i32) {
    %c0_i32 = arith.constant 0 : i32
    %c0_i32_0 = arith.constant 0 : i32
    %c0_i32_1 = arith.constant 0 : i32
    return %c0_i32, %c0_i32_0 : i32, i32
  }
  func.func @transform_5(%arg0: i32) -> (i32, i32) {
    %c0_i32 = arith.constant 0 : i32
    %c0_i32_0 = arith.constant 0 : i32
    %c0_i32_1 = arith.constant 0 : i32
    return %c0_i32, %c0_i32_0 : i32, i32
  }
  func.func @transform_6(%arg0: i32) -> (i32, i32) {
    %c0_i32 = arith.constant 0 : i32
    %c0_i32_0 = arith.constant 0 : i32
    %c0_i32_1 = arith.constant 0 : i32
    return %c0_i32, %c0_i32_0 : i32, i32
  }
  func.func @transform_7(%arg0: i32) -> (i32, i32) {
    %c0_i32 = arith.constant 0 : i32
    %c0_i32_0 = arith.constant 0 : i32
    %c0_i32_1 = arith.constant 0 : i32
    return %c0_i32, %c0_i32_0 : i32, i32
  }
  func.func @transform_8(%arg0: i32) -> (i32, i32) {
    %c0_i32 = arith.constant 0 : i32
    %c0_i32_0 = arith.constant 0 : i32
    %c0_i32_1 = arith.constant 0 : i32
    return %c0_i32, %c0_i32_0 : i32, i32
  }
  func.func @transform_9(%arg0: i32) -> (i32, i32) {
    %c0_i32 = arith.constant 0 : i32
    %c0_i32_0 = arith.constant 0 : i32
    return %arg0, %c0_i32 : i32, i32
  }
}

</mosaic_0001>

<bundles_post_ra>
// kernel: np_encoder_forward.1
= control target key start
LH: loop header
LB: loop body
LE: loop exit
PB: predicated region body
PF: predicated region fallthrough
CT: control target
= control target key end

     0   :  { %s1051_s30 = smov 0   ;;  %s1123_s0 = inlined_call_operand.vmem [shape: f32[128,16], index: 0, kind: input, shape index: {}]   ;;  %s1124_s1 = inlined_call_operand.vmem [shape: f32[128,8], index: 1, kind: input, shape index: {}]   ;;  %s1125_s2 = inlined_call_operand.vmem [shape: bf16[16,32], index: 2, kind: input, shape index: {}]   ;;  %s1126_s3 = inlined_call_operand.vmem [shape: bf16[8,32], index: 3, kind: input, shape index: {}]   ;;  %s1127_s4 = inlined_call_operand.vmem [shape: f32[1,32], index: 4, kind: input, shape index: {}]   ;;  %s1128_s5 = inlined_call_operand.vmem [shape: bf16[32,32], index: 5, kind: input, shape index: {}]   ;;  %s1129_s6 = inlined_call_operand.vmem [shape: f32[1,32], index: 6, kind: input, shape index: {}]   ;;  %s1130_s7 = inlined_call_operand.vmem [shape: bf16[32,32], index: 7, kind: input, shape index: {}]   ;;  %s1131_s8 = inlined_call_operand.vmem [shape: f32[1,32], index: 8, kind: input, shape index: {}]   ;;  %s1132_s9 = inlined_call_operand.vmem [shape: f32[128,32], index: 9, kind: output, shape index: {}]  }
   0x1 LB: > { %s868_s10 = sadd.s32 4294967295, %s999_s30   ;;  %p872_p0 = scmp.ge.s32.totalorder %s999_s30, 1  ;;  %s999_s30 = sphi %s1051_s30, %s19_s30  }
   0x2   : > { %p299_p1 = scmp.lt.s32.totalorder %s999_s30, 3 }
   0x4   : > { %p300_p2 = pnand %p872_p0, %p299_p1 }
   0x5   : > { %v385_v0 = vld [vmem:[%s1126_s3] sm:$0xf] (!%p300_p2)  ;;  %vm399_vm0 = vcmask (!%p300_p2), 1043456   ;;  %s873_s13 = sshll.u32 (!%p300_p2), %s868_s10, 3  ;;  %vm386_vm1 = vcmask (!%p300_p2), 64512   ;;  %vm474_vm2 = vcmask (!%p300_p2), 130048  }
   0x6   : > { %303 = sbr.rel (%p300_p2) target bundleno = 706 (0x2c2), region = 56  ;;  %v988_v1 = vld [vmem:[%s1125_s2] sm:$0xff] (!%p300_p2)   ;;  %979 = vmatprep.subr.msk.bf16.mxu0 (!%p300_p2), %vm399_vm0, %v385_v0  ;;  %v401_v2 = vsel (!%p300_p2), %vm399_vm0, %v385_v0, 0  ;;  %p341_p3 = scmp.lt.s32.totalorder (!%p300_p2), %s873_s13, 15  ;;  %v990_v28 = vld [vmem:[%s1128_s5 + $0x8] sm:$0xff] (!%p300_p2)   ;;  %vm602_vm3 = vcmask (!%p300_p2), 261120  }
   0x7   : > { %928 = vmatpush3.bf16.msra.mxu0 (!%p300_p2), %v401_v2  ;;  %v989_v27 = vld [vmem:[%s1128_s5] sm:$0xff] (!%p300_p2)   ;;  %v992_v59 = vld [vmem:[%s1130_s7 + $0x8] sm:$0xff] (!%p300_p2)  }
   0x8   : > { %937 = vmatprep.subr.bf16.mxu0 (!%p300_p2), %v988_v1  ;;  %947 = vmatprep.subr.bf16.mxu1 (!%p300_p2), %v989_v27  ;;  %v991_v29 = vld [vmem:[%s1130_s7] sm:$0xff] (!%p300_p2)  }
   0x9   : > { %948 = vmatpush3.bf16.msra.mxu1 (!%p300_p2), %v989_v27  ;;  %v888_v30 = vld [vmem:[%s1127_s4] ss:$0 sm:$0xff] (!%p300_p2) }
   0xa   : > { %949 = vmatprep.subr.bf16.mxu1 (!%p300_p2), %v990_v28  ;;  %v889_v60 = vld [vmem:[%s1129_s6] ss:$0 sm:$0xff] (!%p300_p2) }
   0xd   : > { %s1134_s13 = smov (!%p341_p3, %s873_s13), 15  ;;  %950 = vmatpush3.bf16.msra.mxu1 %v990_v28 }
   0xe   : > { %s1065_s16 = sshll.u32 %s1134_s13, 3  ;;  %959 = vmatprep.subr.bf16.mxu1 %v991_v29 }
   0xf   : > { %s350_s19 = scalar_lea.vmem %s1124_s1, %s1065_s16  ;;  %s344_s22 = scalar_lea.vmem %s1123_s0, %s1065_s16 }
  0x10   : > { %v373_v3 = vld [vmem:[%s350_s19] sm:$0xff]  ;;  %v374_v4 = vld [vmem:[%s350_s19 + $0x8] sm:$0xff]  ;;  %v375_v5 = vld [vmem:[%s350_s19 + $0x10] sm:$0xff]  ;;  %s356_s20 = scalar_lea.vmem %s1132_s9, %s1065_s16 }
  0x11   : > { %v381_v6 = vpack.c.bf16 %v374_v4, %v373_v3  ;;  %v376_v7 = vld [vmem:[%s350_s19 + $0x18] sm:$0xff]  ;;  %v377_v8 = vld [vmem:[%s350_s19 + $0x20] sm:$0xff]  ;;  %v378_v9 = vld [vmem:[%s350_s19 + $0x28] sm:$0xff] }
  0x12   : > { %v382_v10 = vpack.c.bf16 %v376_v7, %v375_v5  ;;  %v383_v11 = vpack.c.bf16 %v378_v9, %v377_v8  ;;  %v379_v12 = vld [vmem:[%s350_s19 + $0x30] sm:$0xff]  ;;  %v380_v13 = vld [vmem:[%s350_s19 + $0x38] sm:$0xff]  ;;  %v359_v14 = vld [vmem:[%s344_s22] sm:$0xff] }
  0x13   : > { %929 = vmatprep.mubr.msk.bf16.mxu0 %vm386_vm1, %v381_v6  ;;  %v360_v15 = vld [vmem:[%s344_s22 + $0x8] sm:$0xff]  ;;  %v384_v16 = vpack.c.bf16 %v380_v13, %v379_v12  ;;  %v361_v18 = vld [vmem:[%s344_s22 + $0x10] sm:$0xff]  ;;  %v362_v19 = vld [vmem:[%s344_s22 + $0x18] sm:$0xff] }
  0x14   : > { %930 = vmatmul.mubr.msk.bf16.vlgmr.msra.gmra.mrb[0].mxu0 %vm386_vm1, %v382_v10  ;;  %v367_v17 = vpack.c.bf16 %v360_v15, %v359_v14  ;;  %v363_v20 = vld [vmem:[%s344_s22 + $0x20] sm:$0xff]  ;;  %v364_v21 = vld [vmem:[%s344_s22 + $0x28] sm:$0xff]  ;;  %v368_v22 = vpack.c.bf16 %v362_v19, %v361_v18  ;;  %v365_v24 = vld [vmem:[%s344_s22 + $0x30] sm:$0xff] }
  0x15   : > { %938 = vmatpush3.bf16.msra.mxu0 %v988_v1  ;;  %933 = vmatprep.mubr.msk.bf16.mxu0 %vm386_vm1, %v383_v11  ;;  %v369_v23 = vpack.c.bf16 %v364_v21, %v363_v20  ;;  %v366_v25 = vld [vmem:[%s344_s22 + $0x38] sm:$0xff] }
  0x16   : > { %v370_v26 = vpack.c.bf16 %v366_v25, %v365_v24  ;;  %v896_v25 = vld [vmem:[%s1131_s8] ss:$0 sm:$0xff] }
  0x1c   : > { %934 = vmatmul.mubr.msk.bf16.gmra.mrb[4].mxu0 %vm386_vm1, %v384_v16 }
  0x1d   : > { %939 = vmatprep.mubr.msk.bf16.mxu0 %vm474_vm2, %v367_v17 }
  0x24   : > { %940 = vmatmul.mubr.msk.bf16.vlgmr.msra.gmra.mrb[0].mxu0 %vm474_vm2, %v368_v22 }
  0x25   : > { %943 = vmatprep.mubr.msk.bf16.mxu0 %vm474_vm2, %v369_v23 }
  0x2c   : > { %944 = vmatmul.mubr.msk.bf16.gmra.mrb[4].mxu0 %vm474_vm2, %v370_v26 }
  0xf7   : > { %v941_v31 = vpop.f32.mrb[0].mxu0 }
  0xf8   : > { %v561_v32 = vadd.f32 %v941_v31, %v888_v30  ;;  %v521_v33 = vpop.f32.mrb[1].mxu0 }
  0xf9   : > { %v559_v34 = vadd.f32 %v888_v30, %v521_v33  ;;  %v942_v35 = vpop.f32.mrb[2].mxu0 }
  0xfa   : > { %v562_v36 = vadd.f32 %v942_v35, %v888_v30  ;;  %v524_v37 = vpop.f32.mrb[3].mxu0  ;;  %v569_v39 = vmax.f32 %v561_v32, 0.0 }
  0xfb   : > { %v560_v38 = vadd.f32 %v888_v30, %v524_v37  ;;  %v567_v41 = vmax.f32 %v559_v34, 0.0 }
  0xfc   : > { %v570_v40 = vmax.f32 %v562_v36, 0.0 }
  0xfd   : > { %v568_v42 = vmax.f32 %v560_v38, 0.0 }
  0xfe   : > { %v576_v43 = vpack.c.bf16 %v570_v40, %v569_v39 }
  0xff   : > { %v945_v44 = vpop.f32.mrb[4].mxu0  ;;  %v575_v45 = vpack.c.bf16 %v568_v42, %v567_v41 }
 0x100   : > { %v565_v46 = vadd.f32 %v945_v44, %v888_v30  ;;  %v537_v47 = vpop.f32.mrb[5].mxu0 }
 0x101   : > { %v563_v48 = vadd.f32 %v888_v30, %v537_v47  ;;  %v946_v49 = vpop.f32.mrb[6].mxu0  ;;  %951 = vmatprep.mubr.msk.bf16.mxu1 %vm602_vm3, %v575_v45 }
 0x102   : > { %v566_v50 = vadd.f32 %v946_v49, %v888_v30  ;;  %v540_v51 = vpop.f32.mrb[7].mxu0  ;;  %952 = vmatmul.mubr.msk.bf16.vlgmr.msra.gmra.mrb[0].mxu1 %vm602_vm3, %v576_v43  ;;  %v573_v53 = vmax.f32 %v565_v46, 0.0 }
 0x103   : > { %v564_v52 = vadd.f32 %v888_v30, %v540_v51  ;;  %960 = vmatpush3.bf16.msra.mxu1 %v991_v29  ;;  %v571_v55 = vmax.f32 %v563_v48, 0.0 }
 0x104   : > { %v574_v54 = vmax.f32 %v566_v50, 0.0  ;;  %961 = vmatprep.subr.bf16.mxu1 %v992_v59 }
 0x105   : > { %v572_v56 = vmax.f32 %v564_v52, 0.0 }
 0x106   : > { %v578_v57 = vpack.c.bf16 %v574_v54, %v573_v53 }
 0x107   : > { %v577_v58 = vpack.c.bf16 %v572_v56, %v571_v55  ;;  %962 = vmatpush3.bf16.msra.mxu1 %v992_v59 }
 0x109   : > { %955 = vmatprep.mubr.msk.bf16.mxu1 %vm602_vm3, %v577_v58 }
 0x10a   : > { %956 = vmatmul.mubr.msk.bf16.gmra.mrb[4].mxu1 %vm602_vm3, %v578_v57 }
 0x1d5   : > { %v953_v61 = vpop.f32.mrb[0].mxu1 }
 0x1d6   : > { %v658_v62 = vadd.f32 %v953_v61, %v889_v60  ;;  %v649_v63 = vpop.f32.mrb[1].mxu1 }
 0x1d7   : > { %v650_v0 = vadd.f32 %v889_v60, %v649_v63  ;;  %v954_v1 = vpop.f32.mrb[2].mxu1 }
 0x1d8   : > { %v661_v2 = vadd.f32 %v954_v1, %v889_v60  ;;  %v652_v3 = vpop.f32.mrb[3].mxu1  ;;  %v682_v5 = vmax.f32 %v658_v62, 0.0 }
 0x1d9   : > { %v653_v4 = vadd.f32 %v889_v60, %v652_v3  ;;  %v680_v7 = vmax.f32 %v650_v0, 0.0 }
 0x1da   : > { %v683_v6 = vmax.f32 %v661_v2, 0.0 }
 0x1db   : > { %v681_v8 = vmax.f32 %v653_v4, 0.0 }
 0x1dc   : > { %v689_v9 = vpack.c.bf16 %v683_v6, %v682_v5 }
 0x1dd   : > { %v688_v10 = vpack.c.bf16 %v681_v8, %v680_v7  ;;  %v957_v11 = vpop.f32.mrb[4].mxu1 }
 0x1de   : > { %v674_v12 = vadd.f32 %v957_v11, %v889_v60  ;;  %v665_v13 = vpop.f32.mrb[5].mxu1 }
 0x1df   : > { %v666_v14 = vadd.f32 %v889_v60, %v665_v13  ;;  %v958_v15 = vpop.f32.mrb[6].mxu1  ;;  %963 = vmatprep.mubr.msk.bf16.mxu1 %vm602_vm3, %v688_v10 }
 0x1e0   : > { %v677_v16 = vadd.f32 %v958_v15, %v889_v60  ;;  %v668_v17 = vpop.f32.mrb[7].mxu1  ;;  %964 = vmatmul.mubr.msk.bf16.vlgmr.msra.gmra.mrb[8].mxu1 %vm602_vm3, %v689_v9  ;;  %v686_v19 = vmax.f32 %v674_v12, 0.0 }
 0x1e1   : > { %v669_v18 = vadd.f32 %v889_v60, %v668_v17  ;;  %v684_v21 = vmax.f32 %v666_v14, 0.0 }
 0x1e2   : > { %v687_v20 = vmax.f32 %v677_v16, 0.0 }
 0x1e3   : > { %v685_v22 = vmax.f32 %v669_v18, 0.0 }
 0x1e4   : > { %v691_v23 = vpack.c.bf16 %v687_v20, %v686_v19 }
 0x1e5   : > { %v690_v24 = vpack.c.bf16 %v685_v22, %v684_v21 }
 0x1e7   : > { %967 = vmatprep.mubr.msk.bf16.mxu1 %vm602_vm3, %v690_v24 }
 0x1e8   : > { %968 = vmatmul.mubr.msk.bf16.gmra.mrb[12].mxu1 %vm602_vm3, %v691_v23 }
 0x2b3   : > { %v965_v26 = vpop.f32.mrb[8].mxu1 }
 0x2b4   : > { %v770_v27 = vadd.f32 %v965_v26, %v896_v25  ;;  %v761_v28 = vpop.f32.mrb[9].mxu1 }
 0x2b5   : > { %v762_v29 = vadd.f32 %v896_v25, %v761_v28  ;;  %v966_v30 = vpop.f32.mrb[10].mxu1 }
 0x2b6   : > { %794 = vst.msk [vmem:[%s356_s20 + $0x10] sm:$0xff] %vm602_vm3, %v770_v27  ;;  %v773_v31 = vadd.f32 %v966_v30, %v896_v25  ;;  %v764_v32 = vpop.f32.mrb[11].mxu1 }
 0x2b7   : > { %792 = vst.msk [vmem:[%s356_s20] sm:$0xff] %vm602_vm3, %v762_v29  ;;  %v765_v33 = vadd.f32 %v896_v25, %v764_v32 }
 0x2b8   : > { %795 = vst.msk [vmem:[%s356_s20 + $0x18] sm:$0xff] %vm602_vm3, %v773_v31 }
 0x2b9   : > { %793 = vst.msk [vmem:[%s356_s20 + $0x8] sm:$0xff] %vm602_vm3, %v765_v33 }
 0x2bb   : > { %v969_v34 = vpop.f32.mrb[12].mxu1 }
 0x2bc   : > { %v786_v35 = vadd.f32 %v969_v34, %v896_v25  ;;  %v777_v36 = vpop.f32.mrb[13].mxu1 }
 0x2bd   : > { %v778_v37 = vadd.f32 %v896_v25, %v777_v36  ;;  %v970_v38 = vpop.f32.mrb[14].mxu1 }
 0x2be   : > { %798 = vst.msk [vmem:[%s356_s20 + $0x30] sm:$0xff] %vm602_vm3, %v786_v35  ;;  %v789_v39 = vadd.f32 %v970_v38, %v896_v25  ;;  %v780_v40 = vpop.f32.mrb[15].mxu1 }
 0x2bf   : > { %796 = vst.msk [vmem:[%s356_s20 + $0x20] sm:$0xff] %vm602_vm3, %v778_v37  ;;  %v781_v41 = vadd.f32 %v896_v25, %v780_v40 }
 0x2c0   : > { %799 = vst.msk [vmem:[%s356_s20 + $0x38] sm:$0xff] %vm602_vm3, %v789_v39 }
 0x2c1   : > { %797 = vst.msk [vmem:[%s356_s20 + $0x28] sm:$0xff] %vm602_vm3, %v781_v41 }
 0x2c2 PF: > { %s19_s30 = sadd.s32 1, %s999_s30  }
 0x2c3   : > { %p16_p4 = scmp.ge.s32.totalorder %s19_s30, 4  }
 0x2c5   :  { %18 = sbr.rel (!%p16_p4) target bundleno = 1 (0x1), region = 89 }

</bundles_post_ra>
